<compile_context>
chip_gen: v7x
topology: tpu7x:2x2x1
jax: 0.10.0
libtpu: 0.0.40
codegen_flags: <defaults>
</compile_context>

<pallas_src>
import functools

import jax
import jax.numpy as jnp
from jax import lax
from jax.experimental import pallas as pl
from jax.experimental.pallas import tpu as pltpu

EPS = 1e-5


def _round_up(x, m):
    return (x + m - 1) // m * m


def _bn_relu(y, gamma, beta, *, n_real, n_pad):
    """Train-mode BatchNorm1d (biased var) + ReLU on an (n_pad, tn) f32 tile."""
    inv_n = 1.0 / float(n_real)
    # Padded batch rows of y are exactly zero (zero-padded x, bias dropped),
    # so the column sums only see the real rows.
    mean = jnp.sum(y, axis=0, keepdims=True) * inv_n
    centered = y - mean
    if n_pad > n_real:
        # Two-pass variance: mask the padded rows out of the deviation sum.
        row = lax.broadcasted_iota(jnp.int32, centered.shape, 0)
        centered = jnp.where(row < n_real, centered, 0.0)
    var = jnp.sum(centered * centered, axis=0, keepdims=True) * inv_n
    scale = lax.rsqrt(var + EPS) * gamma          # EUP rsqrt
    shift = beta - mean * scale
    # ReLU; Dropout(p=0) is identity.
    # TODO(synk): nonzero-p dropout would need pltpu.prng_seed/prng_random_bits.
    return jnp.maximum(y * scale + shift, 0.0)


def linear_act_kernel(x_ref, w_ref, gamma_ref, beta_ref, o_ref, *,
                      n_real, n_pad, single_k):
    if single_k:
        # Whole reduction in one step: no accumulator traffic at all.
        y = jnp.dot(x_ref[...], w_ref[...], preferred_element_type=jnp.float32)
        o_ref[...] = _bn_relu(y, gamma_ref[...], beta_ref[...],
                              n_real=n_real, n_pad=n_pad).astype(o_ref.dtype)
    else:
        k = pl.program_id(1)

        @pl.when(k == 0)
        def _():
            o_ref[...] = jnp.zeros_like(o_ref)

        # bf16 operands (pre-cast in the wrapper), f32 accumulation directly
        # into the resident output block.
        o_ref[...] += jnp.dot(x_ref[...], w_ref[...],
                              preferred_element_type=jnp.float32)

        @pl.when(k == pl.num_programs(1) - 1)
        def _():
            o_ref[...] = _bn_relu(o_ref[...], gamma_ref[...], beta_ref[...],
                                  n_real=n_real, n_pad=n_pad).astype(o_ref.dtype)


# Budget for keeping the whole (double-buffered) bf16 activation resident.
_X_RESIDENT_BUDGET = 24 << 20
_PER_BUFFER_BUDGET = 16 << 20


def linear_act(x, w, b, gamma, beta):
    """x: (N, Cin) f32; w: (Cin, Cout); b/gamma/beta: (1, Cout).

    `b` is accepted for API parity with nn.Linear but is mathematically
    cancelled by the train-mode BatchNorm mean subtraction, so it is unused.
    """
    del b  # cancelled exactly by BN's per-channel mean subtraction
    n, c_in = x.shape
    c_out = w.shape[1]

    n_pad = _round_up(n, 16)        # bf16 sublane packing for x
    c_in_pad = _round_up(c_in, 128)
    c_out_pad = _round_up(c_out, 128)

    # ---- tile selection -------------------------------------------------
    # tn: lane-dense output tile.  Prefer >=2 j tiles so the "parallel" axis
    # can split across v7x's two TensorCores; guard the f32 output block's
    # double-buffered VMEM footprint.
    def _tn_fits(t):
        return 2 * n_pad * t * 4 <= _PER_BUFFER_BUDGET

    tn = None
    for t in (512, 256, 128):
        if c_out_pad % t == 0 and c_out_pad // t >= 2 and _tn_fits(t):
            tn = t
            break
    if tn is None:
        for t in (512, 256, 128):
            if c_out_pad % t == 0 and _tn_fits(t):
                tn = t
                break
    if tn is None:
        tn = 128

    # tk: if the whole bf16 activation fits comfortably in VMEM, use the full
    # padded Cin -> x's block index is (0, 0) for every grid step, so it is
    # DMA'd exactly once and the reduction is a single step.  Otherwise use
    # the largest 512/256/128 tile that divides Cin_pad and fits.
    x_resident = 2 * n_pad * c_in_pad * 2 <= _X_RESIDENT_BUDGET
    if x_resident:
        tk = c_in_pad
    else:
        tk = None
        for t in (512, 256, 128):
            if c_in_pad % t == 0 and 2 * n_pad * t * 2 <= _PER_BUFFER_BUDGET:
                tk = t
                break
        if tk is None:
            tk = 128

    j_tiles = c_out_pad // tn
    k_tiles = c_in_pad // tk
    single_k = k_tiles == 1

    # ---- VMEM budget (double-buffered blocks + headroom) -----------------
    bytes_x = 2 * n_pad * tk * 2          # bf16
    bytes_w = 2 * tk * tn * 2             # bf16
    bytes_out = 2 * n_pad * tn * 4        # f32 (accumulates in place)
    bytes_gb = 2 * 2 * tn * 4             # gamma + beta tiles
    needed = bytes_x + bytes_w + bytes_out + bytes_gb
    vmem_limit = max(int(needed * 1.25) + (4 << 20), 32 << 20)
    try:
        phys_vmem = pltpu.get_tpu_info().vmem_capacity_bytes
    except Exception:  # noqa: BLE001 - fall back to the smallest generation
        phys_vmem = 64 << 20              # v7x per-TC physical VMEM
    vmem_limit = int(min(vmem_limit, (phys_vmem * 9) // 10))

    # ---- pad + pre-cast (fused by XLA) -----------------------------------
    x_p = jnp.pad(x, ((0, n_pad - n), (0, c_in_pad - c_in))).astype(jnp.bfloat16)
    w_p = jnp.pad(w, ((0, c_in_pad - c_in),
                      (0, c_out_pad - c_out))).astype(jnp.bfloat16)
    gamma_p = jnp.pad(gamma, ((0, 0), (0, c_out_pad - c_out)))
    beta_p = jnp.pad(beta, ((0, 0), (0, c_out_pad - c_out)))

    kernel = functools.partial(linear_act_kernel,
                               n_real=n, n_pad=n_pad, single_k=single_k)

    out_p = pl.pallas_call(
        kernel,
        out_shape=jax.ShapeDtypeStruct((n_pad, c_out_pad), jnp.float32),
        grid_spec=pltpu.PrefetchScalarGridSpec(
            num_scalar_prefetch=0,
            grid=(j_tiles, k_tiles),                      # (parallel, reduction-last)
            in_specs=[
                # x: (0, k) — constant (0, 0) when resident (single DMA total).
                pl.BlockSpec((n_pad, tk), lambda j, k: (0, k)),
                pl.BlockSpec((tk, tn), lambda j, k: (k, j)),
                # gamma/beta: index depends only on j -> fetched once per j tile.
                pl.BlockSpec((1, tn), lambda j, k: (0, j)),
                pl.BlockSpec((1, tn), lambda j, k: (0, j)),
            ],
            out_specs=pl.BlockSpec((n_pad, tn), lambda j, k: (0, j)),
        ),
        compiler_params=pltpu.CompilerParams(
            dimension_semantics=("parallel", "arbitrary"),
            vmem_limit_bytes=vmem_limit,
        ),
    )(x_p, w_p, gamma_p, beta_p)

    return out_p[:n, :c_out]


def linear_act_ref(x, w, b, gamma, beta, *, matmul_dtype=jnp.float32):
    y = jnp.dot(x.astype(matmul_dtype), w.astype(matmul_dtype),
                preferred_element_type=jnp.float32) + b
    mean = jnp.mean(y, axis=0, keepdims=True)
    var = jnp.mean((y - mean) ** 2, axis=0, keepdims=True)
    y = (y - mean) / jnp.sqrt(var + EPS) * gamma + beta
    return jnp.maximum(y, 0.0)


if __name__ == "__main__":
    # Small shapes consistent with LinearAct(input_channel=32, output_channel=32)
    N, C_IN, C_OUT = 8, 32, 32

    key = jax.random.PRNGKey(0)
    kx, kw, kb = jax.random.split(key, 3)

    x = jax.random.normal(kx, (N, C_IN), dtype=jnp.float32)

    # nn.Linear default init: U(-1/sqrt(Cin), 1/sqrt(Cin))
    bound = 1.0 / (C_IN ** 0.5)
    w = jax.random.uniform(kw, (C_IN, C_OUT), minval=-bound, maxval=bound,
                           dtype=jnp.float32)
    b = jax.random.uniform(kb, (1, C_OUT), minval=-bound, maxval=bound,
                           dtype=jnp.float32)
    # BatchNorm1d affine defaults: gamma=1, beta=0
    gamma = jnp.ones((1, C_OUT), dtype=jnp.float32)
    beta = jnp.zeros((1, C_OUT), dtype=jnp.float32)

    out = jax.block_until_ready(linear_act(x, w, b, gamma, beta))
    assert out.shape == (N, C_OUT)

    # Tight check vs a reference mirroring the kernel's bf16 MXU operands.
    ref_bf16 = linear_act_ref(x, w, b, gamma, beta, matmul_dtype=jnp.bfloat16)
    assert jnp.allclose(out, ref_bf16, atol=1e-4, rtol=1e-4)

    # Looser check vs the pure-f32 PyTorch-equivalent math (bf16 matmul
    # operands introduce ~1e-3-scale differences on BN-normalized outputs).
    ref_f32 = linear_act_ref(x, w, b, gamma, beta, matmul_dtype=jnp.float32)
    assert jnp.allclose(out, ref_f32, atol=5e-2, rtol=5e-2)

    print("KERNEL_OK")
</pallas_src>

<mosaic_0001>
module attributes {stable_mosaic.version = 11 : i64} {
  func.func @linear_act_kernel(%arg0: i32, %arg1: i32, %arg2: memref<16x128xbf16, #tpu.memory_space<vmem>>, %arg3: memref<128x128xbf16, #tpu.memory_space<vmem>>, %arg4: memref<1x128xf32, #tpu.memory_space<vmem>>, %arg5: memref<1x128xf32, #tpu.memory_space<vmem>>, %arg6: memref<16x128xf32, #tpu.memory_space<vmem>>) attributes {dimension_semantics = [#tpu.dimension_semantics<parallel>, #tpu.dimension_semantics<arbitrary>], iteration_bounds = array<i64: 1, 1>, scalar_prefetch = 0 : i64, scratch_operands = 0 : i64, tpu.core_type = #tpu.core_type<tc>, window_params = [{transform_indices = @transform_0, window_bounds = array<i64: 16, 128>}, {transform_indices = @transform_1, window_bounds = array<i64: 128, 128>}, {transform_indices = @transform_2, window_bounds = array<i64: 1, 128>}, {transform_indices = @transform_3, window_bounds = array<i64: 1, 128>}, {transform_indices = @transform_4, window_bounds = array<i64: 16, 128>}]} {
    %c0 = arith.constant 0 : index
    %c0_0 = arith.constant 0 : index
    %0 = vector.load %arg2[%c0, %c0_0] : memref<16x128xbf16, #tpu.memory_space<vmem>>, vector<16x128xbf16>
    %c0_1 = arith.constant 0 : index
    %c0_2 = arith.constant 0 : index
    %1 = vector.load %arg3[%c0_1, %c0_2] : memref<128x128xbf16, #tpu.memory_space<vmem>>, vector<128x128xbf16>
    %cst = arith.constant dense<0.000000e+00> : vector<16x128xf32>
    %2 = tpu.matmul %0, %1, %cst {dimension_numbers = #tpu.dot_dimension_numbers<[1], [0], [0], [1], [0, 0, 1, 1], [], []>} : vector<16x128xbf16>, vector<128x128xbf16>, vector<16x128xf32> -> vector<16x128xf32>
    %c0_3 = arith.constant 0 : index
    %c0_4 = arith.constant 0 : index
    %3 = vector.load %arg4[%c0_3, %c0_4] : memref<1x128xf32, #tpu.memory_space<vmem>>, vector<1x128xf32>
    %c0_5 = arith.constant 0 : index
    %c0_6 = arith.constant 0 : index
    %4 = vector.load %arg5[%c0_5, %c0_6] : memref<1x128xf32, #tpu.memory_space<vmem>>, vector<1x128xf32>
    %cst_7 = arith.constant dense<0.000000e+00> : vector<128xf32>
    %5 = vector.multi_reduction <add>, %2, %cst_7 [0] : vector<16x128xf32> to vector<128xf32>
    %6 = vector.shape_cast %5 : vector<128xf32> to vector<1x128xf32>
    %cst_8 = arith.constant 1.250000e-01 : f32
    %7 = vector.broadcast %cst_8 : f32 to vector<1x128xf32>
    %8 = arith.mulf %6, %7 : vector<1x128xf32>
    %9 = vector.broadcast %8 : vector<1x128xf32> to vector<16x128xf32>
    %10 = arith.subf %2, %9 : vector<16x128xf32>
    %11 = tpu.iota {dimensions = array<i32: 0>} : vector<16x128xi32>
    %c8_i32 = arith.constant 8 : i32
    %12 = vector.broadcast %c8_i32 : i32 to vector<16x128xi32>
    %13 = arith.cmpi slt, %11, %12 : vector<16x128xi32>
    %cst_9 = arith.constant 0.000000e+00 : f32
    %14 = vector.broadcast %cst_9 : f32 to vector<16x128xf32>
    %15 = arith.select %13, %10, %14 : vector<16x128xi1>, vector<16x128xf32>
    %16 = arith.mulf %15, %15 : vector<16x128xf32>
    %cst_10 = arith.constant dense<0.000000e+00> : vector<128xf32>
    %17 = vector.multi_reduction <add>, %16, %cst_10 [0] : vector<16x128xf32> to vector<128xf32>
    %18 = vector.shape_cast %17 : vector<128xf32> to vector<1x128xf32>
    %cst_11 = arith.constant 1.250000e-01 : f32
    %19 = vector.broadcast %cst_11 : f32 to vector<1x128xf32>
    %20 = arith.mulf %18, %19 : vector<1x128xf32>
    %cst_12 = arith.constant 9.99999974E-6 : f32
    %21 = vector.broadcast %cst_12 : f32 to vector<1x128xf32>
    %22 = arith.addf %20, %21 : vector<1x128xf32>
    %23 = math.rsqrt %22 : vector<1x128xf32>
    %24 = arith.mulf %23, %3 : vector<1x128xf32>
    %25 = arith.mulf %8, %24 : vector<1x128xf32>
    %26 = arith.subf %4, %25 : vector<1x128xf32>
    %27 = vector.broadcast %24 : vector<1x128xf32> to vector<16x128xf32>
    %28 = arith.mulf %2, %27 : vector<16x128xf32>
    %29 = vector.broadcast %26 : vector<1x128xf32> to vector<16x128xf32>
    %30 = arith.addf %28, %29 : vector<16x128xf32>
    %cst_13 = arith.constant 0.000000e+00 : f32
    %31 = vector.broadcast %cst_13 : f32 to vector<16x128xf32>
    %32 = arith.maximumf %30, %31 : vector<16x128xf32>
    %c0_14 = arith.constant 0 : index
    %c0_15 = arith.constant 0 : index
    %33 = vector.load %arg6[%c0_14, %c0_15] : memref<16x128xf32, #tpu.memory_space<vmem>>, vector<16x128xf32>
    tpu.vector_store %arg6[%c0_14, %c0_15], %32 {strides = array<i32>} : memref<16x128xf32, #tpu.memory_space<vmem>>, vector<16x128xf32>,
    return
  }
  func.func @transform_0(%arg0: i32, %arg1: i32) -> (i32, i32) {
    %c0_i32 = arith.constant 0 : i32
    %c0_i32_0 = arith.constant 0 : i32
    return %c0_i32, %arg1 : i32, i32
  }
  func.func @transform_1(%arg0: i32, %arg1: i32) -> (i32, i32) {
    %c0_i32 = arith.constant 0 : i32
    return %arg1, %arg0 : i32, i32
  }
  func.func @transform_2(%arg0: i32, %arg1: i32) -> (i32, i32) {
    %c0_i32 = arith.constant 0 : i32
    %c0_i32_0 = arith.constant 0 : i32
    return %c0_i32, %arg0 : i32, i32
  }
  func.func @transform_3(%arg0: i32, %arg1: i32) -> (i32, i32) {
    %c0_i32 = arith.constant 0 : i32
    %c0_i32_0 = arith.constant 0 : i32
    return %c0_i32, %arg0 : i32, i32
  }
  func.func @transform_4(%arg0: i32, %arg1: i32) -> (i32, i32) {
    %c0_i32 = arith.constant 0 : i32
    %c0_i32_0 = arith.constant 0 : i32
    return %c0_i32, %arg0 : i32, i32
  }
}

</mosaic_0001>

<bundles_post_ra>
// kernel: tpu_custom_call.1
= control target key start
LH: loop header
LB: loop body
LE: loop exit
PB: predicated region body
PF: predicated region fallthrough
CT: control target
= control target key end

     0   :  { %9 = vsyncpa [#allocation3], 0  ;;  %s436_s0 = inlined_call_operand.hbm [shape: bf16[16,128], index: 0, kind: input, shape index: {}]   ;;  %s437_s1 = inlined_call_operand.hbm [shape: bf16[128,128], index: 1, kind: input, shape index: {}]   ;;  %s438_s2 = inlined_call_operand.vmem [shape: f32[1,128], index: 2, kind: input, shape index: {}]   ;;  %s439_s3 = inlined_call_operand.vmem [shape: f32[1,128], index: 3, kind: input, shape index: {}]   ;;  %s440_s4 = inlined_call_operand.hbm [shape: f32[16,128], index: 4, kind: output, shape index: {}]  }
   0x1   :  { %10 = vsyncpa [#allocation6], 0 }
   0x2   :  { %11 = vsyncpa [#allocation4], 0  ;;  %s360_s15 = smov [#allocation2]   ;;  %s288_s19 = scalar_lea.hbm %s436_s0, 128 }
   0x3   :  { %s17_s16 = sshll.u32 %s360_s15, 4  ;;  %p289_p0 = scmp.ne.s32.totalorder %s436_s0, %s288_s19  ;;  %s18_s16 = int_to_ptr.vmem [resolvable:$true] %s17_s16 }
   0x4   :  { %p292_p1 = scmp.lt.u32.totalorder %s288_s19, %s436_s0 }
   0x6   :  { %p294_p2 = pnand %p292_p1, %p289_p0 }
   0x8   :  { %297 = shalt.err (!%p294_p2)
}
   0x9   :  { %s298_s24 = scalar_lea.vmem %s18_s16, 128  ;;  %p303_p4 = scmp.lt.s32.totalorder %s18_s16, %s18_s16 }
   0xa   :  { %p299_p3 = scmp.ne.s32.totalorder %s18_s16, %s298_s24  ;;  %p304_p5 = scmp.lt.s32.totalorder %s298_s24, %s298_s24 }
   0xc   :  { %p305_p6 = por %p304_p5, %p303_p4 }
   0xe   :  { %p306_p7 = pnand %p305_p6, %p299_p3 }
  0x10   :  { %309 = shalt.err (!%p306_p7)
}
  0x11   :  { %s361_s25 = smov 64   ;;  %s362_s26 = smov 4  }
  0x12   :  { %23 = dma.hbm_to_vmem [thread:$0]  %s436_s0, 128, %s18_s16, [#allocation3], %s361_s25, %s361_s25, %s362_s26  }
  0x13   :  { %s363_s29 = smov [#allocation5]   ;;  %s310_s7 = scalar_lea.hbm %s437_s1, 1024 }
  0x14   :  { %s29_s30 = sshll.u32 %s363_s29, 4  ;;  %p311_p8 = scmp.ne.s32.totalorder %s437_s1, %s310_s7  ;;  %s30_s30 = int_to_ptr.vmem [resolvable:$true] %s29_s30 }
  0x15   :  { %p314_p9 = scmp.lt.u32.totalorder %s310_s7, %s437_s1 }
  0x17   :  { %p316_p10 = pnand %p314_p9, %p311_p8 }
  0x19   :  { %319 = shalt.err (!%p316_p10)
}
  0x1a   :  { %s320_s12 = scalar_lea.vmem %s30_s30, 1024  ;;  %p325_p12 = scmp.lt.s32.totalorder %s30_s30, %s30_s30 }
  0x1b   :  { %p321_p11 = scmp.ne.s32.totalorder %s30_s30, %s320_s12  ;;  %p326_p13 = scmp.lt.s32.totalorder %s320_s12, %s320_s12 }
  0x1d   :  { %p327_p0 = por %p326_p13, %p325_p12 }
  0x1f   :  { %p328_p1 = pnand %p327_p0, %p321_p11 }
  0x21   :  { %331 = shalt.err (!%p328_p1)
}
  0x22   :  { %35 = dma.hbm_to_vmem [thread:$0]  %s437_s1, 1024, %s30_s30, [#allocation6], %s361_s25, %s361_s25, %s362_s26  }
  0x23   :  { %354 = dma.done.wait [#allocation3], 128  }
  0x24   :  { %355 = vsyncadd [#allocation3], 4294967168 }
  0x25   :  { %356 = dma.done.wait [#allocation6], 1024  }
  0x26   :  { %357 = vsyncadd [#allocation6], 4294966272  ;;  %v364_v0 = vmov 0.0   ;;  %vm365_vm0 = vmmov 0   ;;  %v277_v1 = vld [vmem:[#allocation5] sm:$0xff]   ;;  %v278_v2 = vld [vmem:[#allocation5 + $0x8] sm:$0xff]   ;;  %v194_v32 = vlaneseq }
  0x27   :  { %248 = vmatprep.subr.bf16.mxu0 %v364_v0  ;;  %264 = vmatprep.mubr.msk.bf16.mxu0 %vm365_vm0, %v364_v0  ;;  %v279_v3 = vld [vmem:[#allocation5 + $0x10] sm:$0xff]   ;;  %v280_v4 = vld [vmem:[#allocation5 + $0x18] sm:$0xff]   ;;  %v281_v5 = vld [vmem:[#allocation5 + $0x20] sm:$0xff]   ;;  %s366_s17 = smov [#allocation7]  }
  0x28   :  { %249 = vmatpush3.bf16.msra.mxu0 %v277_v1  ;;  %v282_v6 = vld [vmem:[#allocation5 + $0x28] sm:$0xff]   ;;  %v283_v7 = vld [vmem:[#allocation5 + $0x30] sm:$0xff]   ;;  %v284_v8 = vld [vmem:[#allocation5 + $0x38] sm:$0xff]   ;;  %v195_v33 = vshrl.u32 %v194_v32, 7  ;;  %s217_s18 = sshll.u32 %s366_s17, 4  ;;  %s218_s18 = int_to_ptr.vmem [resolvable:$true] %s217_s18 }
  0x29   :  { %250 = vmatprep.subr.bf16.mxu0 %v364_v0  ;;  %v285_v9 = vld [vmem:[#allocation2] sm:$0xff]   ;;  %p337_p3 = scmp.lt.s32.totalorder %s218_s18, %s218_s18 }
  0x2a   :  { %v160_v34 = vld [vmem:[%s438_s2] sm:$0x1]  ;;  %v196_v35 = vsub.s32 0, %v195_v33  ;;  %s332_s2 = scalar_lea.vmem %s218_s18, 256 }
  0x2b   :  { %v161_v38 = vld [vmem:[%s439_s3] sm:$0x1]  ;;  %p333_p2 = scmp.ne.s32.totalorder %s218_s18, %s332_s2  ;;  %p338_p4 = scmp.lt.s32.totalorder %s332_s2, %s332_s2 }
  0x2c   :  { %251 = vmatpush3.bf16.msra.mxu0 %v278_v2 }
  0x2d   :  { %252 = vmatprep.subr.bf16.mxu0 %v364_v0  ;;  %p339_p5 = por %p338_p4, %p337_p3 }
  0x2f   :  { %p340_p6 = pnand %p339_p5, %p333_p2 }
  0x30   :  { %253 = vmatpush3.bf16.msra.mxu0 %v279_v3 }
  0x31   :  { %254 = vmatprep.subr.bf16.mxu0 %v364_v0 }
  0x34   :  { %255 = vmatpush3.bf16.msra.mxu0 %v280_v4 }
  0x35   :  { %256 = vmatprep.subr.bf16.mxu0 %v364_v0 }
  0x38   :  { %257 = vmatpush3.bf16.msra.mxu0 %v281_v5 }
  0x39   :  { %258 = vmatprep.subr.bf16.mxu0 %v364_v0 }
  0x3c   :  { %259 = vmatpush3.bf16.msra.mxu0 %v282_v6 }
  0x3d   :  { %260 = vmatprep.subr.bf16.mxu0 %v364_v0 }
  0x40   :  { %261 = vmatpush3.bf16.msra.mxu0 %v283_v7 }
  0x41   :  { %262 = vmatprep.subr.bf16.mxu0 %v364_v0 }
  0x44   :  { %263 = vmatpush3.bf16.msra.mxu0 %v284_v8 }
  0x47   :  { %265 = vmatmul.mubr.bf16.vlgmr.msra.gmra.mrb[0].mxu0 %v285_v9 }
 0x11a   :  { %v153_v10 = vpop.f32.mrb[0].mxu0 }
 0x11b   :  { %v266_v11 = vpop.f32.mrb[1].mxu0 }
 0x11c   :  { %v156_v12 = vpop.f32.mrb[2].mxu0 }
 0x11d   :  { %v162_v13 = vadd.f32 %v156_v12, %v153_v10  ;;  %v267_v14 = vpop.f32.mrb[3].mxu0 }
 0x11f   :  { %v163_v15 = vrot.slane %v162_v13, 4 }
 0x121   :  { %v164_v16 = vadd.f32 %v163_v15, %v162_v13 }
 0x123   :  { %v165_v17 = vrot.slane %v164_v16, 2 }
 0x125   :  { %v166_v18 = vadd.f32 %v165_v17, %v164_v16 }
 0x127   :  { %v167_v19 = vrot.slane %v166_v18, 1 }
 0x129   :  { %v168_v20 = vadd.f32 %v167_v19, %v166_v18 }
 0x12b   :  { %v169_v21 = vmul.f32 0.125, %v168_v20 }
 0x12d   :  { %v170_v22 = vsub.f32 %v153_v10, %v169_v21 }
 0x12f   :  { %v179_v23 = vmul.f32 %v170_v22, %v170_v22 }
 0x131   :  { %v182_v24 = vrot.slane %v179_v23, 4 }
 0x133   :  { %v183_v25 = vadd.f32 %v182_v24, %v179_v23 }
 0x135   :  { %v184_v26 = vrot.slane %v183_v25, 2 }
 0x137   :  { %v185_v27 = vadd.f32 %v184_v26, %v183_v25 }
 0x139   :  { %v186_v28 = vrot.slane %v185_v27, 1 }
 0x13b   :  { %v187_v29 = vadd.f32 %v186_v28, %v185_v27 }
 0x13d   :  { %v188_v30 = vmul.f32 0.125, %v187_v29 }
 0x13f   :  { %v189_v31 = vadd.f32 1e-05, %v188_v30 }
 0x141   :  { %286 = vrsqrt.f32 %v189_v31 }
 0x14b   :  { %v287_v36 = vpop.eup %286 }
 0x14c   :  { %v191_v37 = vmul.f32 %v287_v36, %v160_v34 }
 0x14e   :  { %v192_v39 = vmul.f32 %v191_v37, %v169_v21  ;;  %v197_v40 = vrot.slane %v191_v37, %v196_v35 }
 0x150   :  { %v193_v41 = vsub.f32 %v161_v38, %v192_v39  ;;  %v198_v42 = vmul.f32 %v197_v40, %v153_v10  ;;  %v199_v43 = vmul.f32 %v197_v40, %v156_v12 }
 0x152   :  { %v204_v44 = vrot.slane %v193_v41, %v196_v35 }
 0x154   :  { %v206_v45 = vadd.f32 %v204_v44, %v198_v42  ;;  %v207_v46 = vadd.f32 %v204_v44, %v199_v43 }
 0x156   :  { %v208_v47 = vmax.f32 %v206_v45, 0.0  ;;  %v209_v48 = vmax.f32 %v207_v46, 0.0 }
 0x158   :  { %211 = vst [vmem:[#allocation7 + $0x8] sm:$0xff] %v209_v48  ;;  %210 = vst [vmem:[#allocation7] sm:$0xff] %v208_v47 }
 0x159   :  { %343 = shalt.err (!%p340_p6)
}
 0x15a   :  { %s344_s20 = scalar_lea.hbm %s440_s4, 256 }
 0x15b   :  { %p345_p7 = scmp.ne.s32.totalorder %s440_s4, %s344_s20  ;;  %p348_p8 = scmp.lt.u32.totalorder %s344_s20, %s440_s4 }
 0x15d   :  { %p350_p9 = pnand %p348_p8, %p345_p7 }
 0x15f   :  { %353 = shalt.err (!%p350_p9)
}
 0x160   :  { %s367_s25 = smov 128   ;;  %s368_s26 = smov 8  }
 0x161   :  { %223 = dma.vmem_to_hbm [thread:$0]  %s218_s18, 256, %s440_s4, [#allocation4], %s367_s25, %s367_s25, %s368_s26  }
 0x162   :  { %358 = dma.done.wait [#allocation4], 256  }
 0x163   :  { %359 = vsyncadd [#allocation4], 4294967040 }
 0x164   :  { %227 = vsyncpa [#allocation3], 1 }
 0x165   :  { %228 = vsyncpa [#allocation6], 1 }
 0x166   :  { %229 = vsyncpa [#allocation4], 1 }

</bundles_post_ra>
